<compile_context>
chip_gen: v7x
topology: tpu7x:2x2x1
jax: 0.10.0
libtpu: 0.0.40
codegen_flags: <defaults>
</compile_context>

<pallas_src>
import numpy as np
import jax
import jax.numpy as jnp
from jax.experimental import pallas as pl
from jax.experimental.pallas import tpu as pltpu

LANE = 128


# ----------------------------- Pallas kernel -------------------------------

def quantum_layer_kernel(x_ref, sel_ry_ref, sel_rx_ref, w_ref, out_ref):
    """One batch tile.

    x_ref   : [TB, 2Q]  raw interleaved angles (ry0, rx0, ry1, rx1, ...)
    sel_*   : [2Q, Q]   one-hot even/odd column selectors (VMEM-resident)
    w_ref   : [Q, Hp]   transposed, lane-padded Hamiltonian Z coefficients
    out_ref : [TB, Hp]  lane-dense expectations (columns >= H are zero)
    """
    x = x_ref[...]                                                        # [TB, 2Q]

    # De-interleave on the (otherwise idle) MXU: exact one-hot projections,
    # no strided loads, no extra HBM pass in the wrapper.
    ry = jnp.dot(x, sel_ry_ref[...], preferred_element_type=jnp.float32)  # [TB, Q]
    rx = jnp.dot(x, sel_rx_ref[...], preferred_element_type=jnp.float32)  # [TB, Q]

    # normalize_rotations: per-row division by max |.| (guard all-zero rows).
    # Narrow [TB,1] reciprocal, wide VPU multiply.
    ry_max = jnp.max(jnp.abs(ry), axis=-1, keepdims=True)
    rx_max = jnp.max(jnp.abs(rx), axis=-1, keepdims=True)
    inv_ry = 1.0 / jnp.where(ry_max > 0.0, ry_max, 1.0)
    inv_rx = 1.0 / jnp.where(rx_max > 0.0, rx_max, 1.0)
    a = ry * inv_ry
    b = rx * inv_rx

    # <Z_i> = -sin(arcsin(a_i)) * cos(arcsin(b_i)) = -a_i * sqrt(1 - b_i^2)
    z = -a * jnp.sqrt(jnp.maximum(1.0 - b * b, 0.0))                      # [TB, Q]

    # <h_k> = sum_i W[k, i] <Z_i>  ->  [TB, Q] @ [Q, Hp]  (lane-dense N on MXU)
    out_ref[...] = jnp.dot(
        z, w_ref[...], preferred_element_type=jnp.float32
    ).astype(out_ref.dtype)


# --------------------------- one-time param prep ----------------------------

def prepare_quantum_layer_params(w):
    """Module-init analogue, hoisted out of the per-call forward path.

    w : [H, Q] coefficients of synthetic Hamiltonians h_k = sum_i W[k,i] Z_i.
    Returns (sel_ry [2Q,Q], sel_rx [2Q,Q], w_pad [Q,Hp], H).
    """
    w_np = np.asarray(w, dtype=np.float32)
    H, Q = w_np.shape
    Hp = max(LANE, ((H + LANE - 1) // LANE) * LANE)     # lane-dense output width
    twoQ = 2 * Q
    sel_ry = np.zeros((twoQ, Q), np.float32)
    sel_rx = np.zeros((twoQ, Q), np.float32)
    sel_ry[2 * np.arange(Q), np.arange(Q)] = 1.0        # even columns -> ry_i
    sel_rx[2 * np.arange(Q) + 1, np.arange(Q)] = 1.0    # odd  columns -> rx_i
    w_pad = np.zeros((Q, Hp), np.float32)
    w_pad[:, :H] = w_np.T                               # pre-transposed once
    return (jnp.asarray(sel_ry), jnp.asarray(sel_rx), jnp.asarray(w_pad), H)


def _pick_batch_tile(B, twoQ, Q, Hp, vmem_budget_bytes=48 << 20):
    """Largest batch tile whose double-buffered tiles + resident weights fit a
    conservative VMEM budget (v7x has only 64 MiB physical / 32 MiB default)."""
    if B <= 1024 and B % 8 != 0:
        return B                        # single ragged block == full array dim
    tb = min(B, 1024)
    tb -= tb % 8

    def footprint(t):
        return 4 * (2 * t * (twoQ + Hp) + 2 * twoQ * Q + Q * Hp)

    while tb > 8 and footprint(tb) > vmem_budget_bytes:
        tb = max(8, (tb // 2) - (tb // 2) % 8)
    return tb


# ------------------------------- wrapper -------------------------------------

def quantum_layer_forward(x, params):
    """x: [B, 2Q] interleaved angles; params from prepare_quantum_layer_params."""
    sel_ry, sel_rx, w_pad, H = params
    B, D = x.shape
    twoQ, Q = sel_ry.shape
    Hp = w_pad.shape[1]
    assert D == twoQ, "features_per_qubit=2 requires input_dim == 2 * qubit_count"

    TB = _pick_batch_tile(B, twoQ, Q, Hp)
    grid = (pl.cdiv(B, TB),)

    # Explicit scoped-VMEM limit only when the tiles are big enough to need it
    # (v5e default scoped VMEM is 16 MiB of 128 MiB physical).
    est_vmem = 4 * (2 * TB * (twoQ + Hp) + 2 * twoQ * Q + Q * Hp) + (2 << 20)
    vmem_limit = est_vmem if est_vmem > (12 << 20) else None

    cost = pl.CostEstimate(
        flops=2 * B * (2 * twoQ * Q + Q * Hp) + 8 * B * Q,
        transcendentals=B * Q + 2 * B,
        bytes_accessed=4 * (B * twoQ + B * Hp + 2 * twoQ * Q + Q * Hp),
    )

    out_padded = pl.pallas_call(
        quantum_layer_kernel,
        out_shape=jax.ShapeDtypeStruct((B, Hp), jnp.float32),
        grid=grid,
        in_specs=[
            pl.BlockSpec((TB, twoQ), lambda i: (i, 0)),   # batch-tiled activations
            pl.BlockSpec((twoQ, Q), lambda i: (0, 0)),    # VMEM-resident selectors
            pl.BlockSpec((twoQ, Q), lambda i: (0, 0)),
            pl.BlockSpec((Q, Hp), lambda i: (0, 0)),      # VMEM-resident weights
        ],
        out_specs=pl.BlockSpec((TB, Hp), lambda i: (i, 0)),
        compiler_params=pltpu.CompilerParams(
            dimension_semantics=("parallel",),            # megacore-splittable batch
            vmem_limit_bytes=vmem_limit,
        ),
        cost_estimate=cost,
    )(x, sel_ry, sel_rx, w_pad)

    return out_padded[:, :H]


# ------------------- full statevector reference (numpy) ---------------------

def _ref_forward_statevector(x_np, w_np):
    """Brute-force simulation of the exact cudaq circuit + observe()."""
    H_, Q = w_np.shape
    B = x_np.shape[0]
    out = np.zeros((B, H_), dtype=np.float64)
    Hd = np.array([[1, 1], [1, -1]], dtype=complex) / np.sqrt(2)

    def ry_gate(t):
        c, s = np.cos(t / 2), np.sin(t / 2)
        return np.array([[c, -s], [s, c]], dtype=complex)

    def rx_gate(t):
        c, s = np.cos(t / 2), np.sin(t / 2)
        return np.array([[c, -1j * s], [-1j * s, c]], dtype=complex)

    def apply_1q(state, gate, q):
        st = np.moveaxis(state.reshape((2,) * Q), q, 0)
        sh = st.shape
        st = (gate @ st.reshape(2, -1)).reshape(sh)
        return np.moveaxis(st, 0, q).reshape(-1)

    def apply_cx(state, c, t):
        st = state.reshape((2,) * Q).copy()
        idx = [slice(None)] * Q
        idx[c] = 1
        t_ax = t if t < c else t - 1
        st[tuple(idx)] = np.flip(st[tuple(idx)], axis=t_ax)
        return st.reshape(-1)

    def normalize(v):
        m = np.max(np.abs(v))
        return v / m if m != 0 else v

    for bi in range(B):
        row = np.asarray(x_np[bi], dtype=np.float64)
        ry_ang = np.arcsin(normalize(row[0::2]))
        rx_ang = np.arcsin(normalize(row[1::2]))

        state = np.zeros(2 ** Q, dtype=complex)
        state[0] = 1.0
        for q in range(Q):
            state = apply_1q(state, Hd, q)
        for q in range(Q):
            state = apply_1q(state, ry_gate(ry_ang[q]), q)
        for q in range(Q - 1):
            state = apply_cx(state, q, q + 1)
            state = apply_1q(state, rx_gate(rx_ang[q + 1]), q + 1)
            state = apply_cx(state, q, q + 1)
        state = apply_1q(state, rx_gate(rx_ang[0]), 0)

        probs = np.abs(state.reshape((2,) * Q)) ** 2
        zvals = np.zeros(Q)
        for q in range(Q):
            p = np.moveaxis(probs, q, 0)
            zvals[q] = p[0].sum() - p[1].sum()
        out[bi] = w_np.astype(np.float64) @ zvals
    return out


# -------------------------------- main ---------------------------------------

if __name__ == "__main__":
    qubit_count = 8
    num_hamiltonians = 8
    batch = 8
    input_dim = 2 * qubit_count          # features_per_qubit = 2

    key = jax.random.PRNGKey(0)
    kx, kw = jax.random.split(key)
    x = jax.random.uniform(kx, (batch, input_dim), dtype=jnp.float32,
                           minval=-np.pi, maxval=np.pi)
    # deterministic synthetic Hamiltonian coefficients: h_k = sum_i W[k,i] Z_i
    w = jax.random.normal(kw, (num_hamiltonians, qubit_count), dtype=jnp.float32)

    params = prepare_quantum_layer_params(w)   # one-time (module init) prep
    out = quantum_layer_forward(x, params)
    out = jax.block_until_ready(out)

    ref = _ref_forward_statevector(np.asarray(x), np.asarray(w))
    np.testing.assert_allclose(np.asarray(out), ref, rtol=1e-4, atol=1e-5)

    print("KERNEL_OK")
</pallas_src>

<mosaic_0001>
module attributes {stable_mosaic.version = 11 : i64} {
  func.func @quantum_layer_kernel(%arg0: i32, %arg1: memref<8x16xf32, #tpu.memory_space<vmem>>, %arg2: memref<16x8xf32, #tpu.memory_space<vmem>>, %arg3: memref<16x8xf32, #tpu.memory_space<vmem>>, %arg4: memref<8x128xf32, #tpu.memory_space<vmem>>, %arg5: memref<8x128xf32, #tpu.memory_space<vmem>>) attributes {dimension_semantics = [#tpu.dimension_semantics<parallel>], iteration_bounds = array<i64: 1>, scalar_prefetch = 0 : i64, scratch_operands = 0 : i64, tpu.core_type = #tpu.core_type<tc>, window_params = [{transform_indices = @transform_0, window_bounds = array<i64: 8, 16>}, {pipeline_mode = #tpu.pipeline_mode<synchronous>, transform_indices = @transform_1, window_bounds = array<i64: 16, 8>}, {pipeline_mode = #tpu.pipeline_mode<synchronous>, transform_indices = @transform_2, window_bounds = array<i64: 16, 8>}, {pipeline_mode = #tpu.pipeline_mode<synchronous>, transform_indices = @transform_3, window_bounds = array<i64: 8, 128>}, {transform_indices = @transform_4, window_bounds = array<i64: 8, 128>}]} {
    %c0 = arith.constant 0 : index
    %c0_0 = arith.constant 0 : index
    %0 = vector.load %arg1[%c0, %c0_0] : memref<8x16xf32, #tpu.memory_space<vmem>>, vector<8x16xf32>
    %c0_1 = arith.constant 0 : index
    %c0_2 = arith.constant 0 : index
    %1 = vector.load %arg2[%c0_1, %c0_2] : memref<16x8xf32, #tpu.memory_space<vmem>>, vector<16x8xf32>
    %cst = arith.constant dense<0.000000e+00> : vector<8x8xf32>
    %2 = tpu.matmul %0, %1, %cst {dimension_numbers = #tpu.dot_dimension_numbers<[1], [0], [0], [1], [0, 0, 1, 1], [], []>} : vector<8x16xf32>, vector<16x8xf32>, vector<8x8xf32> -> vector<8x8xf32>
    %c0_3 = arith.constant 0 : index
    %c0_4 = arith.constant 0 : index
    %3 = vector.load %arg3[%c0_3, %c0_4] : memref<16x8xf32, #tpu.memory_space<vmem>>, vector<16x8xf32>
    %cst_5 = arith.constant dense<0.000000e+00> : vector<8x8xf32>
    %4 = tpu.matmul %0, %3, %cst_5 {dimension_numbers = #tpu.dot_dimension_numbers<[1], [0], [0], [1], [0, 0, 1, 1], [], []>} : vector<8x16xf32>, vector<16x8xf32>, vector<8x8xf32> -> vector<8x8xf32>
    %5 = math.absf %2 : vector<8x8xf32>
    %cst_6 = arith.constant dense<0xFF800000> : vector<8xf32>
    %6 = vector.multi_reduction <maximumf>, %5, %cst_6 [1] : vector<8x8xf32> to vector<8xf32>
    %7 = vector.shape_cast %6 : vector<8xf32> to vector<8x1xf32>
    %8 = math.absf %4 : vector<8x8xf32>
    %cst_7 = arith.constant dense<0xFF800000> : vector<8xf32>
    %9 = vector.multi_reduction <maximumf>, %8, %cst_7 [1] : vector<8x8xf32> to vector<8xf32>
    %10 = vector.shape_cast %9 : vector<8xf32> to vector<8x1xf32>
    %cst_8 = arith.constant 0.000000e+00 : f32
    %11 = vector.broadcast %cst_8 : f32 to vector<8x1xf32>
    %12 = arith.cmpf ogt, %7, %11 : vector<8x1xf32>
    %cst_9 = arith.constant 1.000000e+00 : f32
    %13 = vector.broadcast %cst_9 : f32 to vector<8x1xf32>
    %14 = arith.select %12, %7, %13 : vector<8x1xi1>, vector<8x1xf32>
    %cst_10 = arith.constant 1.000000e+00 : f32
    %15 = vector.broadcast %cst_10 : f32 to vector<8x1xf32>
    %16 = arith.divf %15, %14 : vector<8x1xf32>
    %cst_11 = arith.constant 0.000000e+00 : f32
    %17 = vector.broadcast %cst_11 : f32 to vector<8x1xf32>
    %18 = arith.cmpf ogt, %10, %17 : vector<8x1xf32>
    %cst_12 = arith.constant 1.000000e+00 : f32
    %19 = vector.broadcast %cst_12 : f32 to vector<8x1xf32>
    %20 = arith.select %18, %10, %19 : vector<8x1xi1>, vector<8x1xf32>
    %cst_13 = arith.constant 1.000000e+00 : f32
    %21 = vector.broadcast %cst_13 : f32 to vector<8x1xf32>
    %22 = arith.divf %21, %20 : vector<8x1xf32>
    %23 = vector.broadcast %16 : vector<8x1xf32> to vector<8x8xf32>
    %24 = arith.mulf %2, %23 : vector<8x8xf32>
    %25 = vector.broadcast %22 : vector<8x1xf32> to vector<8x8xf32>
    %26 = arith.mulf %4, %25 : vector<8x8xf32>
    %cst_14 = arith.constant 0.000000e+00 : f32
    %27 = vector.broadcast %cst_14 : f32 to vector<8x8xf32>
    %28 = arith.subf %27, %24 : vector<8x8xf32>
    %29 = arith.mulf %26, %26 : vector<8x8xf32>
    %cst_15 = arith.constant 1.000000e+00 : f32
    %30 = vector.broadcast %cst_15 : f32 to vector<8x8xf32>
    %31 = arith.subf %30, %29 : vector<8x8xf32>
    %cst_16 = arith.constant 0.000000e+00 : f32
    %32 = vector.broadcast %cst_16 : f32 to vector<8x8xf32>
    %33 = arith.maximumf %31, %32 : vector<8x8xf32>
    %34 = math.sqrt %33 : vector<8x8xf32>
    %35 = arith.mulf %28, %34 : vector<8x8xf32>
    %c0_17 = arith.constant 0 : index
    %c0_18 = arith.constant 0 : index
    %36 = vector.load %arg4[%c0_17, %c0_18] : memref<8x128xf32, #tpu.memory_space<vmem>>, vector<8x128xf32>
    %cst_19 = arith.constant dense<0.000000e+00> : vector<8x128xf32>
    %37 = tpu.matmul %35, %36, %cst_19 {dimension_numbers = #tpu.dot_dimension_numbers<[1], [0], [0], [1], [0, 0, 1, 1], [], []>} : vector<8x8xf32>, vector<8x128xf32>, vector<8x128xf32> -> vector<8x128xf32>
    %c0_20 = arith.constant 0 : index
    %c0_21 = arith.constant 0 : index
    %38 = vector.load %arg5[%c0_20, %c0_21] : memref<8x128xf32, #tpu.memory_space<vmem>>, vector<8x128xf32>
    tpu.vector_store %arg5[%c0_20, %c0_21], %37 {strides = array<i32>} : memref<8x128xf32, #tpu.memory_space<vmem>>, vector<8x128xf32>,
    return
  }
  func.func @transform_0(%arg0: i32) -> (i32, i32) {
    %c0_i32 = arith.constant 0 : i32
    %c0_i32_0 = arith.constant 0 : i32
    return %arg0, %c0_i32 : i32, i32
  }
  func.func @transform_1(%arg0: i32) -> (i32, i32) {
    %c0_i32 = arith.constant 0 : i32
    %c0_i32_0 = arith.constant 0 : i32
    %c0_i32_1 = arith.constant 0 : i32
    return %c0_i32, %c0_i32_0 : i32, i32
  }
  func.func @transform_2(%arg0: i32) -> (i32, i32) {
    %c0_i32 = arith.constant 0 : i32
    %c0_i32_0 = arith.constant 0 : i32
    %c0_i32_1 = arith.constant 0 : i32
    return %c0_i32, %c0_i32_0 : i32, i32
  }
  func.func @transform_3(%arg0: i32) -> (i32, i32) {
    %c0_i32 = arith.constant 0 : i32
    %c0_i32_0 = arith.constant 0 : i32
    %c0_i32_1 = arith.constant 0 : i32
    return %c0_i32, %c0_i32_0 : i32, i32
  }
  func.func @transform_4(%arg0: i32) -> (i32, i32) {
    %c0_i32 = arith.constant 0 : i32
    %c0_i32_0 = arith.constant 0 : i32
    return %arg0, %c0_i32 : i32, i32
  }
}

</mosaic_0001>

<bundles_post_ra>
// kernel: tpu_custom_call.1
= control target key start
LH: loop header
LB: loop body
LE: loop exit
PB: predicated region body
PF: predicated region fallthrough
CT: control target
= control target key end

     0   :  { %v357_v2 = vmov 0.0|0.0   ;;  %vm358_vm0 = vmmov 0   ;;  %v359_v4 = vmov 0.0   ;;  %s422_s0 = inlined_call_operand.vmem [shape: f32[8,16], index: 0, kind: input, shape index: {}]   ;;  %s423_s1 = inlined_call_operand.vmem [shape: f32[16,8], index: 1, kind: input, shape index: {}]   ;;  %s424_s2 = inlined_call_operand.vmem [shape: f32[16,8], index: 2, kind: input, shape index: {}]   ;;  %s425_s3 = inlined_call_operand.vmem [shape: f32[8,128], index: 3, kind: input, shape index: {}]   ;;  %s426_s4 = inlined_call_operand.hbm [shape: f32[8,128], index: 4, kind: output, shape index: {}]  }
   0x1   :  { %v95_v0 = vld [vmem:[%s424_s2] sm:$0xff]  ;;  %v96_v1 = vld [vmem:[%s424_s2 + $0x8] sm:$0xff]  ;;  %320 = vmatprep.subr.bf16.mxu1 %v357_v2  ;;  %309 = vmatprep.mubr.msk.f32.mxu1 %vm358_vm0, %v359_v4 }
   0x2   :  { %v321_v3 = vpack.c.bf16 %v96_v1, %v95_v0  ;;  %v19_v5 = vld [vmem:[%s423_s1] sm:$0xff]  ;;  %v20_v6 = vld [vmem:[%s423_s1 + $0x8] sm:$0xff] }
   0x3   :  { %9 = vsyncpa [#allocation3], 0  ;;  %317 = vmatprep.subr.bf16.mxu0 %v357_v2  ;;  %v318_v7 = vpack.c.bf16 %v20_v6, %v19_v5  ;;  %302 = vmatprep.mubr.msk.f32.mxu0 %vm358_vm0, %v359_v4  ;;  %v18_v8 = vld [vmem:[%s422_s0] sm:$0xff]  ;;  %vm21_vm1 = vcmask 130048   ;;  %vm168_vm2 = vcmask 64512  }
   0x4   :  { %322 = vmatpush3.bf16.msra.mxu1 %v321_v3  ;;  %v198_v17 = vld [vmem:[%s425_s3] sm:$0xff]  ;;  %s360_s3 = smov [#allocation2]  }
   0x5   :  { %319 = vmatpush3.bf16.msra.mxu0 %v318_v7  ;;  %s279_s24 = sshll.u32 %s360_s3, 4  ;;  %s280_s24 = int_to_ptr.vmem [resolvable:$true] %s279_s24 }
   0x6   :  { %312 = vmatprep.subr.mxu0 %v359_v4  ;;  %s333_s25 = scalar_lea.vmem %s280_s24, 128  ;;  %p338_p1 = scmp.lt.s32.totalorder %s280_s24, %s280_s24 }
   0x7   :  { %310 = vmatmul.mubr.msk.f32.vlgmr.msra.gmra.mrb[0].mxu1 %vm21_vm1, %v18_v8  ;;  %p334_p0 = scmp.ne.s32.totalorder %s280_s24, %s333_s25  ;;  %p339_p2 = scmp.lt.s32.totalorder %s333_s25, %s333_s25 }
   0x8   :  { %303 = vmatmul.mubr.msk.f32.vlgmr.msra.gmra.mrb[0].mxu0 %vm21_vm1, %v18_v8 }
   0x9   :  { %314 = vmatprep.mubr.msk.f32.mxu0 %vm358_vm0, %v359_v4  ;;  %313 = vmatpush3.msra.mxu0 %v198_v17  ;;  %p340_p3 = por %p339_p2, %p338_p1 }
   0xb   :  { %p341_p4 = pnand %p340_p3, %p334_p0 }
  0xda   :  { %v163_v9 = vpop.f32.mrb[0].mxu1 }
  0xdb   :  { %v311_v10 = vpop.f32.mrb[1].mxu1  ;;  %v172_v11 = vand.u32 2147483647, %v163_v9  ;;  %v91_v12 = vpop.f32.mrb[0].mxu0 }
  0xdc   :  { %v167_v13 = vand.u32 2147483647, %v91_v12  ;;  %v304_v14 = vpop.f32.mrb[1].mxu0 }
  0xdd   :  { %v173_v15 = vsel %vm168_vm2, %v172_v11, -inf }
  0xde   :  { %174 = vmax.xlane.f32.xlu0 %v173_v15  ;;  %v169_v16 = vsel %vm168_vm2, %v167_v13, -inf }
  0xe2   :  { %170 = vmax.xlane.f32.xlu0 %v169_v16 }
 0x16b   :  { %v175_v18 = vpop.xlane.xlu0 %174 }
 0x16c   :  { %vm180_vm3 = vcmp.gt.f32.partialorder %v175_v18, 0.0 }
 0x16d   :  { %v181_v19 = vsel %vm180_vm3, %v175_v18, 1.0 }
 0x16e   :  { %327 = vrcp.f32 %v181_v19 }
 0x16f   :  { %v171_v20 = vpop.xlane.xlu0 %170 }
 0x170   :  { %vm176_vm4 = vcmp.gt.f32.partialorder %v171_v20, 0.0 }
 0x171   :  { %v177_v23 = vsel %vm176_vm4, %v171_v20, 1.0 }
 0x172   :  { %329 = vrcp.f32 %v177_v23 }
 0x178   :  { %v328_v21 = vpop.eup %327 }
 0x179   :  { %v185_v22 = vmul.f32 %v328_v21, %v163_v9 }
 0x17b   :  { %v187_v24 = vmul.f32 %v185_v22, %v185_v22 }
 0x17c   :  { %v330_v27 = vpop.eup %329 }
 0x17d   :  { %v188_v25 = vsub.f32 1.0, %v187_v24  ;;  %v184_v28 = vmul.f32 %v330_v27, %v91_v12 }
 0x17f   :  { %v189_v26 = vmax.f32 %v188_v25, 0.0  ;;  %v186_v32 = vsub.f32 0.0, %v184_v28 }
 0x181   :  { %331 = vrsqrt.f32 %v189_v26  ;;  %vm192_vm5 = vcmp.eq.f32.partialorder %v189_v26, inf  ;;  %v195_v31 = vand.u32 2147483648, %v189_v26  ;;  %vm194_vm6 = vcmp.eq.f32.partialorder %v189_v26, 0.0 }
 0x18b   :  { %v332_v29 = vpop.eup %331 }
 0x18c   :  { %v191_v30 = vmul.f32 %v332_v29, %v189_v26 }
 0x18e   :  { %v193_v33 = vsel %vm192_vm5, %v189_v26, %v191_v30 }
 0x18f   :  { %v196_v34 = vsel %vm194_vm6, %v195_v31, %v193_v33 }
 0x190   :  { %v197_v35 = vmul.f32 %v196_v34, %v186_v32 }
 0x192   :  { %315 = vmatmul.mubr.msk.f32.vlgmr.msra.gmra.mrb[2].mxu0 %vm168_vm2, %v197_v35 }
 0x265   :  { %v268_v36 = vpop.f32.mrb[2].mxu0 }
 0x266   :  { %272 = vst [vmem:[#allocation2] sm:$0xff] %v268_v36  ;;  %v316_v37 = vpop.f32.mrb[3].mxu0 }
 0x267   :  { %344 = shalt.err (!%p341_p4)
}
 0x268   :  { %s345_s28 = scalar_lea.hbm %s426_s4, 128 }
 0x269   :  { %p346_p5 = scmp.ne.s32.totalorder %s426_s4, %s345_s28  ;;  %p349_p6 = scmp.lt.u32.totalorder %s345_s28, %s426_s4 }
 0x26b   :  { %p351_p7 = pnand %p349_p6, %p346_p5 }
 0x26d   :  { %354 = shalt.err (!%p351_p7)
}
 0x26e   :  { %282 = dma.vmem_to_hbm [thread:$0]  %s280_s24, 128, %s426_s4, [#allocation3]  }
 0x26f   :  { %355 = dma.done.wait [#allocation3], 128  }
 0x270   :  { %356 = vsyncadd [#allocation3], 4294967168 }
 0x271   :  { %286 = vsyncpa [#allocation3], 1 }

</bundles_post_ra>
